<compile_context>
chip_gen: v6e
topology: v6e:2x2x1
jax: 0.10.0
libtpu: 0.0.40
codegen_flags: <defaults>
</compile_context>

<pallas_src>
import jax
import jax.numpy as jnp
from jax.experimental import pallas as pl
from jax.experimental.pallas import tpu as pltpu


# ----------------------------------------------------------------------------
# small helpers
# ----------------------------------------------------------------------------
def _round_up(x: int, m: int) -> int:
    return ((x + m - 1) // m) * m


def _cdiv(a: int, b: int) -> int:
    return (a + b - 1) // b


def _sublane(dtype) -> int:
    """Minimum sublane multiple for the dtype (8 f32, 16 bf16, 32 int8/fp8)."""
    return max(8, 32 // jnp.dtype(dtype).itemsize)


def _balanced_tile(dim: int, max_tile: int, align: int) -> int:
    """Largest aligned tile <= max_tile that splits `dim` into near-equal
    blocks (bounds pad waste to < one alignment unit)."""
    max_tile = max(align, _round_up(max_tile, align))
    padded = _round_up(dim, align)
    if padded <= max_tile:
        return padded
    n_blk = _cdiv(dim, max_tile)
    return _round_up(_cdiv(dim, n_blk), align)


def _vmem_capacity_bytes() -> int:
    try:
        info = pltpu.get_tpu_info()
        cap = getattr(info, "vmem_capacity_bytes", None)
        if cap:
            return int(cap)
    except Exception:
        pass
    return 64 * 1024 * 1024  # conservative (v7x-sized) fallback


def _gen_defaults():
    """Generation-aware tile defaults + VMEM budget/limit."""
    cap = _vmem_capacity_bytes()
    if cap >= 96 * 1024 * 1024:            # v5e / v6e: 128 MiB physical VMEM
        return dict(tm=2048, tn=1024, tk=512,
                    vmem_budget=80 * 1024 * 1024,
                    vmem_limit=96 * 1024 * 1024)
    else:                                   # v7x: 64 MiB physical VMEM
        return dict(tm=1024, tn=1024, tk=512,
                    vmem_budget=36 * 1024 * 1024,
                    vmem_limit=48 * 1024 * 1024)


def _fit_vmem(TM, TN, TK, *, in_itemsize, out_itemsize, needs_acc, budget, sub):
    """Shrink (TK first, then TM, then TN) until double-buffered tiles fit."""
    def usage(tm_, tn_, tk_):
        b = 2 * (tm_ * tk_ + tk_ * tn_) * in_itemsize   # 2x-buffered x, W
        b += 2 * tm_ * tn_ * out_itemsize               # 2x-buffered out
        b += 2 * tn_ * 4                                # bias (negligible)
        if needs_acc:
            b += tm_ * tn_ * 4                          # f32 scratch accumulator
        return b

    def floor_half(v, a):
        return max(a, (v // 2) // a * a)

    while usage(TM, TN, TK) > budget:
        if TK > 128:
            TK = floor_half(TK, 128)
        elif TM > max(sub, 256):
            TM = floor_half(TM, sub)
        elif TN > 256:
            TN = floor_half(TN, 128)
        elif TM > sub:
            TM = floor_half(TM, sub)
        elif TN > 128:
            TN = floor_half(TN, 128)
        else:
            break
    return TM, TN, TK


def _blend_f32(m, a_trg, a_meta):
    """mask-blend done in f32 (precision safe for bf16 params), cast back."""
    out = (m * a_trg.astype(jnp.float32)
           + (1.0 - m) * a_meta.astype(jnp.float32))
    return out.astype(a_trg.dtype)


# ----------------------------------------------------------------------------
# kernels
# ----------------------------------------------------------------------------
def _linear_kernel_f32out(x_ref, w_ref, b_ref, o_ref):
    """x @ W + b for one (TM, TN) tile, accumulating directly into the
    resident f32 output block (no scratch -> VMEM headroom for bigger tiles)."""
    k = pl.program_id(2)

    @pl.when(k == 0)
    def _():
        o_ref[...] = jnp.broadcast_to(b_ref[...].astype(jnp.float32),
                                      o_ref.shape)

    o_ref[...] += jnp.dot(x_ref[...], w_ref[...],
                          preferred_element_type=jnp.float32)


def _linear_kernel_acc(x_ref, w_ref, b_ref, o_ref, acc_ref):
    """Same, but with an f32 scratch accumulator (bf16/fp8 outputs)."""
    k = pl.program_id(2)

    @pl.when(k == 0)
    def _():
        acc_ref[...] = jnp.broadcast_to(b_ref[...].astype(jnp.float32),
                                        acc_ref.shape)

    acc_ref[...] += jnp.dot(x_ref[...], w_ref[...],
                            preferred_element_type=jnp.float32)

    @pl.when(k == pl.num_programs(2) - 1)
    def _():
        o_ref[...] = acc_ref[...].astype(o_ref.dtype)


def _padded_linear_call(x2p, wp, bp2, TM, TN, TK, out_dtype, vmem_limit):
    """pallas_call on already-padded (Mp,Kp) x, (Kp,Np) W, (1,Np) b."""
    Mp, Kp = x2p.shape
    Np = wp.shape[1]
    grid = (Mp // TM, Np // TN, Kp // TK)

    f32_out = jnp.dtype(out_dtype) == jnp.dtype(jnp.float32)
    kernel = _linear_kernel_f32out if f32_out else _linear_kernel_acc
    scratch = [] if f32_out else [pltpu.VMEM((TM, TN), jnp.float32)]

    return pl.pallas_call(
        kernel,
        out_shape=jax.ShapeDtypeStruct((Mp, Np), out_dtype),
        grid_spec=pltpu.PrefetchScalarGridSpec(
            num_scalar_prefetch=0,
            grid=grid,
            in_specs=[
                pl.BlockSpec((TM, TK), lambda i, j, k: (i, k)),   # x tile
                pl.BlockSpec((TK, TN), lambda i, j, k: (k, j)),   # W tile
                pl.BlockSpec((1, TN), lambda i, j, k: (0, j)),    # bias tile
            ],
            out_specs=pl.BlockSpec((TM, TN), lambda i, j, k: (i, j)),
            scratch_shapes=scratch,
        ),
        compiler_params=pltpu.CompilerParams(
            dimension_semantics=("parallel", "parallel", "arbitrary"),
            vmem_limit_bytes=vmem_limit,
        ),
        cost_estimate=pl.CostEstimate(
            flops=2 * Mp * Kp * Np,
            transcendentals=0,
            bytes_accessed=(Mp * Kp * x2p.dtype.itemsize
                            + Kp * Np * wp.dtype.itemsize
                            + Mp * Np * jnp.dtype(out_dtype).itemsize),
        ),
    )(x2p, wp, bp2)


# ----------------------------------------------------------------------------
# standalone functional wrapper (blend + pad + tile selection per call)
# ----------------------------------------------------------------------------
def incubation_linear(x, w_trg_t, b_trg, w_meta_t, b_meta, mask,
                      *, tm=None, tn=None, tk=None):
    """x: (B, S, K); w_*_t: (K, N) (transposed from PyTorch (N, K)); b_*: (N,).
    mask is a Python float fixed at trace time.

    Returns (B, S, N) = mask * (x @ Wt + bt) + (1 - mask) * (x @ Wm + bm).
    """
    B, S, K = x.shape
    N = w_trg_t.shape[1]
    M = B * S
    m = float(mask)

    d = _gen_defaults()
    tm = d["tm"] if tm is None else tm
    tn = d["tn"] if tn is None else tn
    tk = d["tk"] if tk is None else tk

    if m == 1.0:                      # pure target path (bit-exact)
        w, b = w_trg_t, b_trg
    elif m == 0.0:                    # pure meta path (bit-exact)
        w, b = w_meta_t, b_meta
    else:                             # O(K*N) blend instead of 2nd matmul
        w = _blend_f32(m, w_trg_t, w_meta_t)
        b = _blend_f32(m, b_trg, b_meta)

    out_dtype = x.dtype
    sub = _sublane(x.dtype)
    needs_acc = jnp.dtype(out_dtype) != jnp.dtype(jnp.float32)

    # Balanced, alignment-guarded tiles (caller args rounded to sublane/128).
    TM = _balanced_tile(M, tm, sub)
    TN = _balanced_tile(N, tn, 128)
    TK = _balanced_tile(K, tk, 128)

    # Megacore: ensure >= 2 parallel blocks (shrink TM before TN).
    if _cdiv(M, TM) * _cdiv(N, TN) == 1:
        if M > sub:
            TM = _round_up(_cdiv(M, 2), sub)
        elif N > 128:
            TN = _round_up(_cdiv(N, 2), 128)

    TM, TN, TK = _fit_vmem(TM, TN, TK,
                           in_itemsize=jnp.dtype(x.dtype).itemsize,
                           out_itemsize=jnp.dtype(out_dtype).itemsize,
                           needs_acc=needs_acc,
                           budget=d["vmem_budget"], sub=sub)

    Mp, Kp, Np = _round_up(M, TM), _round_up(K, TK), _round_up(N, TN)

    x2 = x.reshape(M, K)
    b2 = b.reshape(1, N)
    # Zero-padding of the K tail is load-bearing: it is accumulated by the
    # kernel, so it must be zeros (do not switch to partial blocks casually).
    if (Mp, Kp) != (M, K):
        x2 = jnp.pad(x2, ((0, Mp - M), (0, Kp - K)))
    if (Kp, Np) != (K, N):
        w = jnp.pad(w, ((0, Kp - K), (0, Np - N)))
    if Np != N:
        b2 = jnp.pad(b2, ((0, 0), (0, Np - N)))

    out_p = _padded_linear_call(x2, w, b2, TM, TN, TK, out_dtype,
                                d["vmem_limit"])
    return out_p[:M, :N].reshape(B, S, N)


# ----------------------------------------------------------------------------
# layer class: weights padded once, blend cached per mask value
# ----------------------------------------------------------------------------
class GlobalMaskSchedule:
    """Deterministic stand-in for the module's global_mask_schedule."""

    def __init__(self, mask_value: float):
        self._mask = float(mask_value)

    def get_mask(self) -> float:
        return self._mask


class IncubationLayerPallas:
    """JAX/Pallas port of IncubationLayer for the nn.Linear case."""

    def __init__(self, meta_params, trg_params, global_mask_schedule,
                 *, tm=None, tn=None, tk=None):
        meta_w, meta_b = meta_params
        trg_w, trg_b = trg_params
        # (K, N) layout ONCE (PyTorch nn.Linear weight is (N, K)).
        trg_wt = jnp.transpose(jnp.asarray(trg_w))
        meta_wt = jnp.transpose(jnp.asarray(meta_w))
        trg_b = jnp.asarray(trg_b)
        meta_b = jnp.asarray(meta_b)

        K, N = trg_wt.shape
        self.K, self.N = K, N
        self.global_mask_schedule = global_mask_schedule
        self.dtype = trg_wt.dtype
        self._sub = _sublane(self.dtype)

        d = _gen_defaults()
        self.vmem_limit = d["vmem_limit"]
        tm = d["tm"] if tm is None else tm
        tn = d["tn"] if tn is None else tn
        tk = d["tk"] if tk is None else tk

        needs_acc = jnp.dtype(self.dtype) != jnp.dtype(jnp.float32)
        TN = _balanced_tile(N, tn, 128)
        TK = _balanced_tile(K, tk, 128)
        TM_max = _round_up(max(self._sub, tm), self._sub)
        # Fit against the LARGEST TM we'll ever use; per-call TM only shrinks,
        # so the VMEM budget holds for every forward.
        TM_max, TN, TK = _fit_vmem(
            TM_max, TN, TK,
            in_itemsize=jnp.dtype(self.dtype).itemsize,
            out_itemsize=jnp.dtype(self.dtype).itemsize,
            needs_acc=needs_acc,
            budget=d["vmem_budget"], sub=self._sub)
        self.TM_max, self.TN, self.TK = TM_max, TN, TK
        self.Kp = _round_up(K, TK)
        self.Np = _round_up(N, TN)

        # Pad weights/biases to tile multiples ONCE (hoisted out of forward).
        def pad_w(w):
            return jnp.pad(w, ((0, self.Kp - K), (0, self.Np - N)))

        def pad_b(bv):
            return jnp.pad(bv.reshape(1, N), ((0, 0), (0, self.Np - N)))

        self.trg_wt_p, self.trg_b_p = pad_w(trg_wt), pad_b(trg_b)
        self.meta_wt_p, self.meta_b_p = pad_w(meta_wt), pad_b(meta_b)
        self._blend_cache = {}

    def _blended(self, m: float):
        """Padded, mask-blended (W, b); cached per mask value (the mask changes
        per schedule step, not per forward)."""
        if m not in self._blend_cache:
            if m == 1.0:
                wb = (self.trg_wt_p, self.trg_b_p)
            elif m == 0.0:
                wb = (self.meta_wt_p, self.meta_b_p)
            else:
                wb = (_blend_f32(m, self.trg_wt_p, self.meta_wt_p),
                      _blend_f32(m, self.trg_b_p, self.meta_b_p))
            self._blend_cache[m] = wb
        return self._blend_cache[m]

    def __call__(self, x):
        mask = float(self.global_mask_schedule.get_mask())
        w_p, b_p = self._blended(mask)

        B, S, K = x.shape
        assert K == self.K, "hidden dim mismatch"
        M = B * S
        sub = self._sub

        TM = _balanced_tile(M, self.TM_max, sub)
        Mp = _round_up(M, TM)
        # Megacore: if the parallel grid would be 1x1, split TM so both
        # TensorCores (v7x) get work; negligible cost on single-TC parts.
        if (Mp // TM) * (self.Np // self.TN) == 1 and M > sub:
            TM = _round_up(_cdiv(M, 2), sub)
            Mp = _round_up(M, TM)

        x2 = x.reshape(M, K)
        if (Mp, self.Kp) != (M, K):
            # Zero-padded K tail is load-bearing (it is accumulated).
            x2 = jnp.pad(x2, ((0, Mp - M), (0, self.Kp - K)))

        out_p = _padded_linear_call(x2, w_p, b_p, TM, self.TN, self.TK,
                                    x.dtype, self.vmem_limit)
        return out_p[:M, :self.N].reshape(B, S, self.N)


# ----------------------------------------------------------------------------
# tests
# ----------------------------------------------------------------------------
if __name__ == "__main__":
    key = jax.random.PRNGKey(0)
    (kx, kwt, kbt, kwm, kbm,
     kx2, kwt2, kbt2, kwm2, kbm2) = jax.random.split(key, 10)

    # --- small shape implied by forward: (batch, seq, hidden) -> Linear ----
    B, S, K, N = 2, 8, 32, 32
    x = jax.random.normal(kx, (B, S, K), dtype=jnp.float32)
    w_trg = jax.random.normal(kwt, (N, K), dtype=jnp.float32) * 0.05
    b_trg = jax.random.normal(kbt, (N,), dtype=jnp.float32) * 0.05
    w_meta = jax.random.normal(kwm, (N, K), dtype=jnp.float32) * 0.05
    b_meta = jax.random.normal(kbm, (N,), dtype=jnp.float32) * 0.05

    layer = IncubationLayerPallas(
        meta_params=(w_meta, b_meta),
        trg_params=(w_trg, b_trg),
        global_mask_schedule=GlobalMaskSchedule(0.3),
    )

    out = jax.block_until_ready(layer(x))
    mask = 0.3
    ref = mask * (x @ w_trg.T + b_trg) + (1.0 - mask) * (x @ w_meta.T + b_meta)
    assert out.shape == (B, S, N)
    assert jnp.allclose(out, ref, atol=1e-4, rtol=1e-4), "mismatch (blend)"

    # mask == 1 fast path (pure target linear, bit-exact weight path).
    layer.global_mask_schedule = GlobalMaskSchedule(1.0)
    out1 = jax.block_until_ready(layer(x))
    ref1 = x @ w_trg.T + b_trg
    assert jnp.allclose(out1, ref1, atol=1e-5, rtol=1e-5), "mismatch (mask=1)"

    # mask == 0 fast path (pure meta linear).
    layer.global_mask_schedule = GlobalMaskSchedule(0.0)
    out0 = jax.block_until_ready(layer(x))
    ref0 = x @ w_meta.T + b_meta
    assert jnp.allclose(out0, ref0, atol=1e-5, rtol=1e-5), "mismatch (mask=0)"

    # --- slightly larger shape with tiny tiles to exercise the full tiled
    #     (M, N, K) grid, output-resident accumulation, and K reduction ------
    K2, N2 = 256, 256
    x_b = jax.random.normal(kx2, (B, S, K2), dtype=jnp.float32)
    w_trg_b = jax.random.normal(kwt2, (N2, K2), dtype=jnp.float32) * 0.02
    b_trg_b = jax.random.normal(kbt2, (N2,), dtype=jnp.float32) * 0.02
    w_meta_b = jax.random.normal(kwm2, (N2, K2), dtype=jnp.float32) * 0.02
    b_meta_b = jax.random.normal(kbm2, (N2,), dtype=jnp.float32) * 0.02

    out_b = incubation_linear(
        x_b, jnp.transpose(w_trg_b), b_trg_b,
        jnp.transpose(w_meta_b), b_meta_b, 0.75,
        tm=8, tn=128, tk=128)
    out_b = jax.block_until_ready(out_b)
    ref_b = (0.75 * (x_b @ w_trg_b.T + b_trg_b)
             + 0.25 * (x_b @ w_meta_b.T + b_meta_b))
    assert jnp.allclose(out_b, ref_b, atol=1e-3, rtol=1e-3), "mismatch (tiled)"

    print("KERNEL_OK")
</pallas_src>

<mosaic_0001>
module attributes {stable_mosaic.version = 11 : i64} {
  func.func @_linear_kernel_f32out(%arg0: i32, %arg1: i32, %arg2: i32, %arg3: memref<8x128xf32, #tpu.memory_space<vmem>>, %arg4: memref<128x128xf32, #tpu.memory_space<vmem>>, %arg5: memref<1x128xf32, #tpu.memory_space<vmem>>, %arg6: memref<8x128xf32, #tpu.memory_space<vmem>>) attributes {dimension_semantics = [#tpu.dimension_semantics<parallel>, #tpu.dimension_semantics<parallel>, #tpu.dimension_semantics<arbitrary>], iteration_bounds = array<i64: 2, 1, 1>, scalar_prefetch = 0 : i64, scratch_operands = 0 : i64, tpu.core_type = #tpu.core_type<tc>, window_params = [{transform_indices = @transform_0, window_bounds = array<i64: 8, 128>}, {transform_indices = @transform_1, window_bounds = array<i64: 128, 128>}, {transform_indices = @transform_2, window_bounds = array<i64: 1, 128>}, {transform_indices = @transform_3, window_bounds = array<i64: 8, 128>}]} {
    %c0_i32 = arith.constant 0 : i32
    %0 = arith.cmpi eq, %arg2, %c0_i32 : i32
    %1 = arith.extui %0 : i1 to i32
    %c0_i32_0 = arith.constant 0 : i32
    %2 = arith.cmpi ne, %1, %c0_i32_0 : i32
    scf.if %2 {
      %c0_8 = arith.constant 0 : index
      %c0_9 = arith.constant 0 : index
      %9 = vector.load %arg5[%c0_8, %c0_9] : memref<1x128xf32, #tpu.memory_space<vmem>>, vector<1x128xf32>
      %10 = vector.shape_cast %9 : vector<1x128xf32> to vector<1x128xf32>
      %11 = vector.broadcast %10 : vector<1x128xf32> to vector<8x128xf32>
      %c0_10 = arith.constant 0 : index
      %c0_11 = arith.constant 0 : index
      %12 = vector.load %arg6[%c0_10, %c0_11] : memref<8x128xf32, #tpu.memory_space<vmem>>, vector<8x128xf32>
      tpu.vector_store %arg6[%c0_10, %c0_11], %11 {strides = array<i32>} : memref<8x128xf32, #tpu.memory_space<vmem>>, vector<8x128xf32>,
    } else {
    }
    %c0 = arith.constant 0 : index
    %c0_1 = arith.constant 0 : index
    %3 = vector.load %arg6[%c0, %c0_1] : memref<8x128xf32, #tpu.memory_space<vmem>>, vector<8x128xf32>
    %c0_2 = arith.constant 0 : index
    %c0_3 = arith.constant 0 : index
    %4 = vector.load %arg3[%c0_2, %c0_3] : memref<8x128xf32, #tpu.memory_space<vmem>>, vector<8x128xf32>
    %c0_4 = arith.constant 0 : index
    %c0_5 = arith.constant 0 : index
    %5 = vector.load %arg4[%c0_4, %c0_5] : memref<128x128xf32, #tpu.memory_space<vmem>>, vector<128x128xf32>
    %cst = arith.constant dense<0.000000e+00> : vector<8x128xf32>
    %6 = tpu.matmul %4, %5, %cst {dimension_numbers = #tpu.dot_dimension_numbers<[1], [0], [0], [1], [0, 0, 1, 1], [], []>} : vector<8x128xf32>, vector<128x128xf32>, vector<8x128xf32> -> vector<8x128xf32>
    %7 = arith.addf %3, %6 : vector<8x128xf32>
    %c0_6 = arith.constant 0 : index
    %c0_7 = arith.constant 0 : index
    %8 = vector.load %arg6[%c0_6, %c0_7] : memref<8x128xf32, #tpu.memory_space<vmem>>, vector<8x128xf32>
    tpu.vector_store %arg6[%c0_6, %c0_7], %7 {strides = array<i32>} : memref<8x128xf32, #tpu.memory_space<vmem>>, vector<8x128xf32>,
    return
  }
  func.func @transform_0(%arg0: i32, %arg1: i32, %arg2: i32) -> (i32, i32) {
    %c0_i32 = arith.constant 0 : i32
    return %arg0, %arg2 : i32, i32
  }
  func.func @transform_1(%arg0: i32, %arg1: i32, %arg2: i32) -> (i32, i32) {
    %c0_i32 = arith.constant 0 : i32
    return %arg2, %arg1 : i32, i32
  }
  func.func @transform_2(%arg0: i32, %arg1: i32, %arg2: i32) -> (i32, i32) {
    %c0_i32 = arith.constant 0 : i32
    %c0_i32_0 = arith.constant 0 : i32
    return %c0_i32, %arg1 : i32, i32
  }
  func.func @transform_3(%arg0: i32, %arg1: i32, %arg2: i32) -> (i32, i32) {
    %c0_i32 = arith.constant 0 : i32
    return %arg0, %arg1 : i32, i32
  }
}

</mosaic_0001>

<bundles_post_ra>
// kernel: tpu_custom_call.1
= control target key start
LH: loop header
LB: loop body
LE: loop exit
PB: predicated region body
PF: predicated region fallthrough
CT: control target
= control target key end

     0   :  { %8 = vsyncpa [#allocation3], 0  ;;  %s973_s0 = inlined_call_operand.hbm [shape: f32[16,128], index: 0, kind: input, shape index: {}]   ;;  %s974_s1 = inlined_call_operand.hbm [shape: f32[128,128], index: 1, kind: input, shape index: {}]   ;;  %s975_s2 = inlined_call_operand.vmem [shape: f32[1,128], index: 2, kind: input, shape index: {}]   ;;  %s976_s3 = inlined_call_operand.hbm [shape: f32[16,128], index: 3, kind: output, shape index: {}]  }
   0x1   :  { %10 = vsyncpa [#allocation3 + $0x1], 0 }
   0x2   :  { %11 = vsyncpa [#allocation6], 0 }
   0x3   :  { %12 = vsyncpa [#allocation4], 0 }
   0x4   :  { %14 = vsyncpa [#allocation4 + $0x1], 0  ;;  %s790_s12 = smov 0   ;;  %s792_s13 = smov 0  }
   0x5   :  { %s794_s14 = smov 0   ;;  %s796_s15 = smov 0  }
   0x6   :  { %s798_s16 = smov 0   ;;  %s800_s17 = smov 0  }
   0x7 LB: > { %s477_s18 = sadd.s32 4294967295, %s761_s17   ;;  %s478_s19 = sadd.s32 4294967294, %s761_s17   ;;  %s761_s17 = sphi %s800_s17, %s20_s17   ;;  %s757_s16 = sphi %s798_s16, %s994_s16   ;;  %s753_s15 = sphi %s796_s15, %s993_s15   ;;  %s749_s14 = sphi %s794_s14, %s992_s14   ;;  %s745_s13 = sphi %s792_s13, %s991_s13   ;;  %s741_s12 = sphi %s790_s12, %s990_s12  }
   0x8   : > { %p61_p0 = scmp.ne.s32.totalorder %s745_s13, %s741_s12  ;;  %p824_p1 = scmp.eq.s32.totalorder %s477_s18, 0 }
   0x9   : > { %p828_p2 = scmp.eq.s32.totalorder %s477_s18, 1  ;;  %p147_p3 = scmp.eq.s32.totalorder %s478_s19, 1 }
   0xa   : > { %p834_p4 = por %p824_p1, %p61_p0  ;;  %p479_p5 = scmp.ge.s32.totalorder %s761_s17, 1 }
   0xb   : > { %p839_p6 = por %p147_p3, %p61_p0  ;;  %p154_p7 = scmp.lt.s32.totalorder %s761_s17, 3 }
   0xc   : > { %s980_s22 = scalar_select %p834_p4, 1, 0 }
   0xd   : > { %s981_s23 = scalar_select %p839_p6, 1, 0 }
   0xe   : > { %p844_p8 = pnand %p479_p5, %p154_p7  ;;  %s763_s25 = smov [#allocation5]  }
   0xf   : > { %s170_s26 = sshll.u32 %s763_s25, 4  ;;  %s39_s28 = sadd.s32 1, %s757_s16  ;;  %s171_s26 = int_to_ptr.vmem [resolvable:$true] %s170_s26 }
  0x10   : > { %p554_p9 = pneg %p844_p8  ;;  %s634_s29 = scalar_lea.vmem %s171_s26, 2048 }
  0x11   : > { %p635_p13 = scmp.ne.s32.totalorder %s171_s26, %s634_s29  ;;  %p642_p5 = scmp.lt.s32.totalorder %s171_s26, %s171_s26 }
  0x12   : > { %p853_p11 = pnand %p554_p9, %p824_p1  ;;  %p643_p7 = scmp.lt.s32.totalorder %s634_s29, %s634_s29 }
  0x14   : > { %p625_p12 = pneg %p853_p11  ;;  %p644_p6 = por %p643_p7, %p642_p5 }
  0x16   : > { %p637_p0 = pnand %p635_p13, %p625_p12 }
  0x18   : > { %p638_p3 = pneg %p637_p0 }
  0x1a   : > { %p645_p4 = pnand %p644_p6, %p638_p3 }
  0x1c   : > { %648 = shalt.err (!%p645_p4)
}
  0x1d   : > { %s764_s30 = smov 128   ;;  %s765_s4 = smov 8  }
  0x1e   : > { %557 = dma.hbm_to_vmem [thread:$0]  (!%p853_p11), %s974_s1, 2048, %s171_s26, [#allocation6], %s764_s30, %s764_s30, %s765_s4  }
  0x1f   : > { %p41_p6 = scmp.ge.s32.totalorder %s39_s28, 2  ;;  %s48_s7 = sadd.s32 1, %s749_s14 }
  0x20   : > { %p55_p4 = scmp.ne.s32.totalorder %s749_s14, %s745_s13  ;;  %p56_p9 = scmp.eq.s32.totalorder %s761_s17, 0 }
  0x21   : > { %s996_s28 = smov (%p41_p6, %s39_s28), 0  ;;  %p567_p0 = scmp.lt.s32.totalorder %s761_s17, 2 }
  0x22   : > { %p871_p12 = por %p56_p9, %p55_p4  ;;  %p877_p13 = por %p828_p2, %p55_p4 }
  0x23   : > { %s43_s10 = ssub.s32 %s757_s16, %s996_s28  ;;  %s190_s11 = sand.u32 1, %s749_s14  }
  0x24   : > { %p46_p11 = scmp.eq.s32.totalorder %s43_s10, 0  ;;  %s483_s18 = sshll.u32 %s190_s11, 3 }
  0x25   : > { %s484_s25 = sshll.u32 %s757_s16, 7  ;;  %s194_s30 = scalar_lea.vmem [#allocation2], %s483_s18 }
  0x26   : > { %s886_s19 = scalar_select %p46_p11, %s749_s14, %s48_s7  }
  0x27   : > { %s200_s29 = scalar_lea.hbm %s973_s0, %s484_s25  ;;  %s202_s4 = sshll.u32 %s194_s30, 4  ;;  %s203_s4 = int_to_ptr.vmem [resolvable:$true] %s202_s4 }
  0x28   : > { %p894_p2 = pnand %p567_p0, %p871_p12  ;;  %s191_s5 = scalar_lea.sflag [#allocation3], %s190_s11 }
  0x29   : > { %s662_s6 = scalar_lea.vmem %s203_s4, 128  ;;  %s766_s7 = smov [#allocation2]  }
  0x2a   : > { %p651_p3 = pneg %p894_p2  ;;  %p663_p5 = scmp.ne.s32.totalorder %s203_s4, %s662_s6 }
  0x2b   : > { %s667_s10 = sshll.u32 %s766_s7, 4  ;;  %s668_s10 = int_to_ptr.vmem [resolvable:$false] %s667_s10 }
  0x2c   : > { %p665_p7 = pnand %p663_p5, %p651_p3  ;;  %s669_s25 = scalar_lea.vmem %s668_s10, 256 }
  0x2d   : > { %p670_p4 = scmp.lt.s32.totalorder %s203_s4, %s668_s10  ;;  %p671_p9 = scmp.lt.s32.totalorder %s669_s25, %s662_s6 }
  0x2e   : > { %p666_p6 = pneg %p665_p7 }
  0x2f   : > { %p672_p11 = por %p671_p9, %p670_p4 }
  0x31   : > { %p673_p10 = pnand %p672_p11, %p666_p6 }
  0x33   : > { %676 = shalt.err (!%p673_p10)
}
  0x34   : > { %561 = dma.hbm_to_vmem [thread:$0]  (!%p894_p2), %s200_s29, 128, %s203_s4, %s191_s5  }
  0x35   : > { %211 = sbr.rel (%p844_p8) target bundleno = 302 (0x12e), region = 32  ;;  %s905_s8 = sand.u32 (!%p844_p8), 1, %s745_s13  }
  0x36   : > { %s486_s11 = sshll.u32 (!%p844_p8), %s905_s8, 3  ;;  %s214_s18 = scalar_lea.sflag (!%p844_p8), [#allocation3], %s905_s8 }
  0x37   : > { %s911_s26 = scalar_lea.vmem (!%p844_p8), [#allocation2], %s486_s11  ;;  %p987_p12 = scmp.ne.s32.totalorder (!%p844_p8), %s980_s22, 0 }
  0x3a   : > { %728 = dma.done.wait (%p987_p12), %s214_s18, 128  }
  0x3b   : > { %730 = vsyncadd (%p987_p12), %s214_s18, 4294967168 }
  0x3c   : > { %732 = dma.done.wait (%p824_p1), [#allocation6], 2048  }
  0x3d   : > { %734 = vsyncadd (%p824_p1), [#allocation6], 4294965248  ;;  %v767_v0 = vmov 0.0   ;;  %vm768_vm0 = vmmov 0   ;;  %v280_v1 = vld [vmem:[#allocation5 + $0x78] sm:$0xff]  ;;  %v279_v2 = vld [vmem:[#allocation5 + $0x70] sm:$0xff] }
  0x3e   : > { %511 = vmatprep.subr.mxu0 %v767_v0  ;;  %543 = vmatprep.mubr.msk.f32.mxu0 %vm768_vm0, %v767_v0  ;;  %v278_v3 = vld [vmem:[#allocation5 + $0x68] sm:$0xff]  ;;  %v277_v4 = vld [vmem:[#allocation5 + $0x60] sm:$0xff]  ;;  %v276_v5 = vld [vmem:[#allocation5 + $0x58] sm:$0xff]  ;;  %s491_s24 = sshll.u32 %s753_s15, 7  ;;  %s246_s27 = scalar_lea.vmem [#allocation7], %s486_s11 }
  0x3f   : > { %512 = vmatpush3.msra.mxu0 %v280_v1  ;;  %v275_v6 = vld [vmem:[#allocation5 + $0x50] sm:$0xff]  ;;  %v274_v7 = vld [vmem:[#allocation5 + $0x48] sm:$0xff]  ;;  %v273_v8 = vld [vmem:[#allocation5 + $0x40] sm:$0xff]  ;;  %s368_s29 = sshll.u32 %s246_s27, 4  ;;  %s931_s21 = scalar_lea.hbm %s976_s3, %s491_s24  ;;  %s369_s29 = int_to_ptr.vmem [resolvable:$true] %s368_s29 }
  0x40   : > { %513 = vmatprep.subr.mxu0 %v767_v0  ;;  %v272_v9 = vld [vmem:[#allocation5 + $0x38] sm:$0xff]  ;;  %v271_v10 = vld [vmem:[#allocation5 + $0x30] sm:$0xff]  ;;  %v270_v11 = vld [vmem:[#allocation5 + $0x28] sm:$0xff]  ;;  %s354_s5 = scalar_lea.sflag [#allocation4], %s905_s8  ;;  %s677_s6 = scalar_lea.vmem %s369_s29, 128 }
  0x41   : > { %514 = vmatpush3.msra.mxu0 %v279_v2  ;;  %v269_v12 = vld [vmem:[#allocation5 + $0x20] sm:$0xff]  ;;  %v268_v13 = vld [vmem:[#allocation5 + $0x18] sm:$0xff]  ;;  %v267_v14 = vld [vmem:[#allocation5 + $0x10] sm:$0xff]  ;;  %p678_p1 = scmp.ne.s32.totalorder %s369_s29, %s677_s6  ;;  %s769_s15 = smov [#allocation7]  }
  0x42   : > { %515 = vmatprep.subr.mxu0 %v767_v0  ;;  %v266_v15 = vld [vmem:[#allocation5 + $0x8] sm:$0xff]  ;;  %v265_v16 = vld [vmem:[#allocation5] sm:$0xff]  ;;  %v264_v17 = vld [vmem:[%s911_s26] sm:$0xff]  ;;  %s681_s7 = sshll.u32 %s769_s15, 4  ;;  %s682_s7 = int_to_ptr.vmem [resolvable:$false] %s681_s7 }
  0x43   : > { %516 = vmatpush3.msra.mxu0 %v278_v3  ;;  %v489_v18 = vld [vmem:[%s975_s2] ss:$0 sm:$0xff]  ;;  %p679_p8 = pnand %p678_p1, %p877_p13  ;;  %s683_s10 = scalar_lea.vmem %s682_s7, 256 }
  0x44   : > { %517 = vmatprep.subr.mxu0 %v767_v0  ;;  %p684_p0 = scmp.lt.s32.totalorder %s369_s29, %s682_s7  ;;  %p685_p2 = scmp.lt.s32.totalorder %s683_s10, %s677_s6 }
  0x45   : > { %518 = vmatpush3.msra.mxu0 %v277_v4  ;;  %p680_p10 = pneg %p679_p8 }
  0x46   : > { %519 = vmatprep.subr.mxu0 %v767_v0  ;;  %p686_p3 = por %p685_p2, %p684_p0 }
  0x47   : > { %520 = vmatpush3.msra.mxu0 %v276_v5 }
  0x48   : > { %521 = vmatprep.subr.mxu0 %v767_v0  ;;  %p687_p5 = pnand %p686_p3, %p680_p10 }
  0x49   : > { %522 = vmatpush3.msra.mxu0 %v275_v6 }
  0x4a   : > { %523 = vmatprep.subr.mxu0 %v767_v0 }
  0x4b   : > { %524 = vmatpush3.msra.mxu0 %v274_v7 }
  0x4c   : > { %525 = vmatprep.subr.mxu0 %v767_v0 }
  0x4d   : > { %526 = vmatpush3.msra.mxu0 %v273_v8 }
  0x4e   : > { %527 = vmatprep.subr.mxu0 %v767_v0 }
  0x4f   : > { %528 = vmatpush3.msra.mxu0 %v272_v9 }
  0x50   : > { %529 = vmatprep.subr.mxu0 %v767_v0 }
  0x51   : > { %530 = vmatpush3.msra.mxu0 %v271_v10 }
  0x52   : > { %531 = vmatprep.subr.mxu0 %v767_v0 }
  0x53   : > { %532 = vmatpush3.msra.mxu0 %v270_v11 }
  0x54   : > { %533 = vmatprep.subr.mxu0 %v767_v0 }
  0x55   : > { %534 = vmatpush3.msra.mxu0 %v269_v12 }
  0x56   : > { %535 = vmatprep.subr.mxu0 %v767_v0 }
  0x57   : > { %536 = vmatpush3.msra.mxu0 %v268_v13 }
  0x58   : > { %537 = vmatprep.subr.mxu0 %v767_v0 }
  0x59   : > { %538 = vmatpush3.msra.mxu0 %v267_v14 }
  0x5a   : > { %539 = vmatprep.subr.mxu0 %v767_v0 }
  0x5b   : > { %540 = vmatpush3.msra.mxu0 %v266_v15 }
  0x5c   : > { %541 = vmatprep.subr.mxu0 %v767_v0 }
  0x5d   : > { %542 = vmatpush3.msra.mxu0 %v265_v16 }
  0x5e   : > { %544 = vmatmul.mubr.f32.vlgmr.msra.gmra.mxu0 %v264_v17 }
 0x11e   : > { %v347_v19 = vpop.f32.mrf.mxu0 }
 0x11f   : > { %v351_v20 = vadd.f32 %v489_v18, %v347_v19 }
 0x120   : > { %v545_v21 = vpop.f32.mrf.mxu0 }
 0x121   : > { %352 = vst [vmem:[%s246_s27] sm:$0xff] %v351_v20 }
 0x122   : > { %690 = shalt.err (!%p687_p5)
}
 0x123   : > { %s691_s25 = scalar_lea.hbm %s931_s21, 128  ;;  %s695_s18 = scalar_lea.hbm %s976_s3, 256 }
 0x124   : > { %p692_p7 = scmp.ne.s32.totalorder %s931_s21, %s691_s25  ;;  %p696_p9 = scmp.lt.s32.totalorder %s931_s21, %s976_s3 }
 0x125   : > { %p697_p11 = scmp.lt.s32.totalorder %s695_s18, %s691_s25 }
 0x126   : > { %p693_p6 = pnand %p692_p7, %p877_p13 }
 0x127   : > { %p698_p12 = por %p697_p11, %p696_p9 }
 0x128   : > { %p694_p4 = pneg %p693_p6 }
 0x12a   : > { %p699_p1 = pnand %p698_p12, %p694_p4 }
 0x12c   : > { %702 = shalt.err (!%p699_p1)
}
 0x12d   : > { %552 = dma.vmem_to_hbm [thread:$0]  (%p877_p13), %s369_s29, 128, %s931_s21, %s354_s5  }
 0x12e PF: > { %s380_s22 = sand.u32 1, %s741_s12   ;;  %p988_p8 = scmp.ne.s32.totalorder %s981_s23, 0 }
 0x12f   : > { %p989_p10 = scmp.ge.s32.totalorder %s761_s17, 2  ;;  %s381_s24 = scalar_lea.sflag [#allocation4], %s380_s22 }
 0x131   : > { %p563_p0 = pnand %p989_p10, %p988_p8 }
 0x133   : > { %p564_p2 = pneg %p563_p0 }
 0x135   : > { %736 = dma.done.wait (%p564_p2), %s381_s24, 128  }
 0x136   : > { %738 = vsyncadd (%p564_p2), %s381_s24, 4294967168  ;;  %s20_s17 = sadd.s32 1, %s761_s17   ;;  %s990_s12 = smov %s745_s13 }
 0x137   : > { %p17_p3 = scmp.ge.s32.totalorder %s20_s17, 4   ;;  %s991_s13 = smov %s749_s14 }
 0x138   : > { %s992_s14 = smov %s886_s19  ;;  %s993_s15 = smov %s757_s16 }
 0x139   : > { %s994_s16 = smov %s996_s28  ;;  %19 = sbr.rel (!%p17_p3) target bundleno = 7 (0x7), region = 89 }
 0x13e   :  { %386 = vsyncpa [#allocation3], 1 }
 0x13f   :  { %388 = vsyncpa [#allocation3 + $0x1], 1 }
 0x140   :  { %389 = vsyncpa [#allocation6], 1 }
 0x141   :  { %390 = vsyncpa [#allocation4], 1 }
 0x142   :  { %392 = vsyncpa [#allocation4 + $0x1], 1 }

</bundles_post_ra>
